<compile_context>
chip_gen: v6e
topology: v6e:2x2x1
jax: 0.10.0
libtpu: 0.0.40
codegen_flags: <defaults>
</compile_context>

<pallas_src>
import jax
import jax.numpy as jnp
from jax.experimental import pallas as pl
from jax.experimental.pallas import tpu as pltpu

LANE = 128
MAX_TROW = 1024  # 1024 * 128 * 4 B = 512 KiB per block buffer


def _complex_sigmoid_kernel(re_ref, im_ref, ore_ref, oim_ref):
    # Single-transcendental sigmoid: sigmoid(x) == 0.5 * (tanh(0.5*x) + 1).
    ore_ref[...] = 0.5 * (jnp.tanh(0.5 * re_ref[...]) + 1.0)
    oim_ref[...] = 0.5 * (jnp.tanh(0.5 * im_ref[...]) + 1.0)


def naive_complex_sigmoid(x):
    """x: complex array of any shape (e.g. NCHW). Returns complex64."""
    orig_shape = x.shape
    n = x.size

    # Two separate f32 planes (no stacked-slab materialization).
    x_re = jnp.real(x).astype(jnp.float32).reshape(-1)
    x_im = jnp.imag(x).astype(jnp.float32).reshape(-1)

    # Pad only to the next multiple of LANE, and only when actually needed.
    padded = pl.cdiv(n, LANE) * LANE
    pad = padded - n
    if pad:
        x_re = jnp.pad(x_re, (0, pad))
        x_im = jnp.pad(x_im, (0, pad))

    rows = padded // LANE
    x_re2d = x_re.reshape(rows, LANE)
    x_im2d = x_im.reshape(rows, LANE)

    # Block rows: multiple of 8 sublanes, capped at MAX_TROW, and chosen so
    # the grid has >= 2 steps whenever rows > 8 (keeps both v7x TCs busy).
    if rows > 8:
        half = ((pl.cdiv(rows, 2) + 7) // 8) * 8
        trow = min(MAX_TROW, half)
    else:
        trow = rows  # full-array block (grid of 1) for tiny inputs
    grid = (pl.cdiv(rows, trow),)

    spec = pl.BlockSpec((trow, LANE), lambda i: (i, 0))

    out_re2d, out_im2d = pl.pallas_call(
        _complex_sigmoid_kernel,
        out_shape=(
            jax.ShapeDtypeStruct((rows, LANE), jnp.float32),
            jax.ShapeDtypeStruct((rows, LANE), jnp.float32),
        ),
        grid_spec=pltpu.PrefetchScalarGridSpec(
            num_scalar_prefetch=0,
            grid=grid,
            in_specs=[spec, spec],
            out_specs=[spec, spec],
        ),
        compiler_params=pltpu.CompilerParams(
            dimension_semantics=("parallel",),
            # Let the real/imag extraction fuse into the pallas input DMA
            # instead of materializing the planes in HBM.
            allow_input_fusion=[True, True],
        ),
        cost_estimate=pl.CostEstimate(
            flops=6 * padded,             # mul/add/mul per element, 2 planes
            transcendentals=2 * padded,   # one tanh per element, 2 planes
            bytes_accessed=4 * 4 * padded,  # 2 plane reads + 2 plane writes
        ),
    )(x_re2d, x_im2d)

    # Block-aligned per-plane outputs: two contiguous reshapes feeding one
    # fused lax.complex pass; slice only when we actually padded.
    out_re = out_re2d.reshape(-1)
    out_im = out_im2d.reshape(-1)
    if pad:
        out_re = out_re[:n]
        out_im = out_im[:n]
    out_re = out_re.reshape(orig_shape)
    out_im = out_im.reshape(orig_shape)
    return jax.lax.complex(out_re, out_im).astype(jnp.complex64)


def _reference(x):
    return (jax.nn.sigmoid(jnp.real(x))
            + 1j * jax.nn.sigmoid(jnp.imag(x))).astype(jnp.complex64)


if __name__ == "__main__":
    key = jax.random.PRNGKey(0)

    # Primary test: small NCHW complex input matching the PyTorch module use.
    k1, k2 = jax.random.split(key)
    B, C, H, W = 2, 4, 16, 16
    x_re = jax.random.normal(k1, (B, C, H, W), dtype=jnp.float32)
    x_im = jax.random.normal(k2, (B, C, H, W), dtype=jnp.float32)
    x = jax.lax.complex(x_re, x_im).astype(jnp.complex64)

    out = jax.block_until_ready(naive_complex_sigmoid(x))
    ref = _reference(x)
    assert out.shape == (B, C, H, W)
    assert out.dtype == jnp.complex64
    assert jnp.allclose(out, ref, atol=1e-5, rtol=1e-5)

    # Secondary test: non-128-aligned size -> exercises the pad-to-LANE path
    # and a ragged last grid block (rows=11, trow=8, grid=(2,)).
    k3, k4 = jax.random.split(k2)
    y_re = jax.random.normal(k3, (1, 2, 10, 65), dtype=jnp.float32)
    y_im = jax.random.normal(k4, (1, 2, 10, 65), dtype=jnp.float32)
    y = jax.lax.complex(y_re, y_im).astype(jnp.complex64)

    out2 = jax.block_until_ready(naive_complex_sigmoid(y))
    ref2 = _reference(y)
    assert out2.shape == y.shape
    assert out2.dtype == jnp.complex64
    assert jnp.allclose(out2, ref2, atol=1e-5, rtol=1e-5)

    print("KERNEL_OK")
</pallas_src>

<mosaic_0001>
module attributes {stable_mosaic.version = 11 : i64} {
  func.func @_complex_sigmoid_kernel(%arg0: i32, %arg1: memref<8x128xf32, #tpu.memory_space<vmem>>, %arg2: memref<8x128xf32, #tpu.memory_space<vmem>>, %arg3: memref<8x128xf32, #tpu.memory_space<vmem>>, %arg4: memref<8x128xf32, #tpu.memory_space<vmem>>) attributes {dimension_semantics = [#tpu.dimension_semantics<parallel>], iteration_bounds = array<i64: 2>, scalar_prefetch = 0 : i64, scratch_operands = 0 : i64, tpu.core_type = #tpu.core_type<tc>, window_params = [{transform_indices = @transform_0, window_bounds = array<i64: 8, 128>}, {transform_indices = @transform_1, window_bounds = array<i64: 8, 128>}, {transform_indices = @transform_2, window_bounds = array<i64: 8, 128>}, {transform_indices = @transform_3, window_bounds = array<i64: 8, 128>}]} {
    %c0 = arith.constant 0 : index
    %c0_0 = arith.constant 0 : index
    %0 = vector.load %arg1[%c0, %c0_0] : memref<8x128xf32, #tpu.memory_space<vmem>>, vector<8x128xf32>
    %cst = arith.constant 5.000000e-01 : f32
    %1 = vector.broadcast %cst : f32 to vector<8x128xf32>
    %2 = arith.mulf %1, %0 : vector<8x128xf32>
    %3 = math.tanh %2 : vector<8x128xf32>
    %cst_1 = arith.constant 1.000000e+00 : f32
    %4 = vector.broadcast %cst_1 : f32 to vector<8x128xf32>
    %5 = arith.addf %3, %4 : vector<8x128xf32>
    %cst_2 = arith.constant 5.000000e-01 : f32
    %6 = vector.broadcast %cst_2 : f32 to vector<8x128xf32>
    %7 = arith.mulf %6, %5 : vector<8x128xf32>
    %c0_3 = arith.constant 0 : index
    %c0_4 = arith.constant 0 : index
    %8 = vector.load %arg3[%c0_3, %c0_4] : memref<8x128xf32, #tpu.memory_space<vmem>>, vector<8x128xf32>
    tpu.vector_store %arg3[%c0_3, %c0_4], %7 {strides = array<i32>} : memref<8x128xf32, #tpu.memory_space<vmem>>, vector<8x128xf32>,
    %c0_5 = arith.constant 0 : index
    %c0_6 = arith.constant 0 : index
    %9 = vector.load %arg2[%c0_5, %c0_6] : memref<8x128xf32, #tpu.memory_space<vmem>>, vector<8x128xf32>
    %cst_7 = arith.constant 5.000000e-01 : f32
    %10 = vector.broadcast %cst_7 : f32 to vector<8x128xf32>
    %11 = arith.mulf %10, %9 : vector<8x128xf32>
    %12 = math.tanh %11 : vector<8x128xf32>
    %cst_8 = arith.constant 1.000000e+00 : f32
    %13 = vector.broadcast %cst_8 : f32 to vector<8x128xf32>
    %14 = arith.addf %12, %13 : vector<8x128xf32>
    %cst_9 = arith.constant 5.000000e-01 : f32
    %15 = vector.broadcast %cst_9 : f32 to vector<8x128xf32>
    %16 = arith.mulf %15, %14 : vector<8x128xf32>
    %c0_10 = arith.constant 0 : index
    %c0_11 = arith.constant 0 : index
    %17 = vector.load %arg4[%c0_10, %c0_11] : memref<8x128xf32, #tpu.memory_space<vmem>>, vector<8x128xf32>
    tpu.vector_store %arg4[%c0_10, %c0_11], %16 {strides = array<i32>} : memref<8x128xf32, #tpu.memory_space<vmem>>, vector<8x128xf32>,
    return
  }
  func.func @transform_0(%arg0: i32) -> (i32, i32) {
    %c0_i32 = arith.constant 0 : i32
    %c0_i32_0 = arith.constant 0 : i32
    return %arg0, %c0_i32 : i32, i32
  }
  func.func @transform_1(%arg0: i32) -> (i32, i32) {
    %c0_i32 = arith.constant 0 : i32
    %c0_i32_0 = arith.constant 0 : i32
    return %arg0, %c0_i32 : i32, i32
  }
  func.func @transform_2(%arg0: i32) -> (i32, i32) {
    %c0_i32 = arith.constant 0 : i32
    %c0_i32_0 = arith.constant 0 : i32
    return %arg0, %c0_i32 : i32, i32
  }
  func.func @transform_3(%arg0: i32) -> (i32, i32) {
    %c0_i32 = arith.constant 0 : i32
    %c0_i32_0 = arith.constant 0 : i32
    return %arg0, %c0_i32 : i32, i32
  }
}

</mosaic_0001>

<bundles_post_ra>
// kernel: tpu_custom_call.1
= control target key start
LH: loop header
LB: loop body
LE: loop exit
PB: predicated region body
PF: predicated region fallthrough
CT: control target
= control target key end

     0   :  { %9 = vsyncpa [#allocation3], 0  ;;  %s901_s0 = inlined_call_operand.hbm [shape: f32[16,128], index: 0, kind: input, shape index: {}]   ;;  %s902_s1 = inlined_call_operand.hbm [shape: f32[16,128], index: 1, kind: input, shape index: {}]   ;;  %s903_s2 = inlined_call_operand.hbm [shape: f32[16,128], index: 2, kind: output, shape index: {0}]   ;;  %s904_s3 = inlined_call_operand.hbm [shape: f32[16,128], index: 3, kind: output, shape index: {1}]  }
   0x1   :  { %11 = vsyncpa [#allocation3 + $0x1], 0 }
   0x2   :  { %12 = vsyncpa [#allocation6], 0 }
   0x3   :  { %14 = vsyncpa [#allocation6 + $0x1], 0 }
   0x4   :  { %15 = vsyncpa [#allocation4], 0 }
   0x5   :  { %17 = vsyncpa [#allocation4 + $0x1], 0 }
   0x6   :  { %18 = vsyncpa [#allocation9], 0 }
   0x7   :  { %20 = vsyncpa [#allocation9 + $0x1], 0  ;;  %s661_s12 = smov 0   ;;  %s663_s13 = smov 0  }
   0x8   :  { %s665_s14 = smov 0   ;;  %s667_s15 = smov 0  }
   0x9 LB: > { %s682_s16 = sadd.s32 4294967295, %s635_s15   ;;  %s403_s17 = sadd.s32 4294967294, %s635_s15   ;;  %s635_s15 = sphi %s667_s15, %s923_s15   ;;  %s631_s14 = sphi %s665_s14, %s922_s14   ;;  %s627_s13 = sphi %s663_s13, %s921_s13   ;;  %s623_s12 = sphi %s661_s12, %s920_s12  }
   0xa   : > { %s686_s18 = sadd.s32 1, %s635_s15   ;;  %s33_s19 = sadd.s32 1, %s631_s14 }
   0xb   : > { %s30_s20 = ssub.s32 %s635_s15, %s686_s18  ;;  %p40_p0 = scmp.ne.s32.totalorder %s631_s14, %s627_s13 }
   0xc   : > { %p31_p1 = scmp.eq.s32.totalorder %s30_s20, 0  ;;  %p41_p2 = scmp.eq.s32.totalorder %s635_s15, 0 }
   0xd   : > { %p46_p3 = scmp.ne.s32.totalorder %s627_s13, %s623_s12  ;;  %p47_p4 = scmp.eq.s32.totalorder %s682_s16, 0 }
   0xe   : > { %s698_s21 = scalar_select %p31_p1, %s631_s14, %s33_s19  }
   0xf   : > { %p700_p5 = por %p41_p2, %p40_p0  ;;  %p704_p6 = por %p47_p4, %p46_p3 }
  0x10   : > { %p96_p7 = scmp.eq.s32.totalorder %s682_s16, 1  ;;  %p102_p8 = scmp.eq.s32.totalorder %s403_s17, 1 }
  0x11   : > { %s908_s23 = scalar_select %p704_p6, 1, 0 }
  0x12   : > { %p443_p10 = scmp.lt.s32.totalorder %s635_s15, 2  ;;  %p711_p11 = por %p96_p7, %p40_p0 }
  0x13   : > { %p715_p12 = por %p102_p8, %p46_p3  ;;  %s720_s26 = sand.u32 1, %s631_s14  }
  0x14   : > { %s909_s24 = scalar_select %p711_p11, 1, 0 }
  0x15   : > { %s910_s25 = scalar_select %p715_p12, 1, 0 }
  0x16   : > { %s407_s27 = sshll.u32 %s635_s15, 7  ;;  %s406_s28 = sshll.u32 %s720_s26, 3 }
  0x17   : > { %s729_s4 = scalar_lea.hbm %s901_s0, %s407_s27  ;;  %s152_s5 = scalar_lea.vmem [#allocation2], %s406_s28 }
  0x18   : > { %s159_s6 = sshll.u32 %s152_s5, 4  ;;  %p735_p13 = pnand %p443_p10, %p700_p5  ;;  %s739_s6 = int_to_ptr.vmem [resolvable:$true] %s159_s6 }
  0x19   : > { %s149_s8 = scalar_lea.sflag [#allocation3], %s720_s26  ;;  %s481_s9 = scalar_lea.hbm %s729_s4, 128 }
  0x1a   : > { %p482_p2 = scmp.ne.s32.totalorder %s729_s4, %s481_s9  ;;  %p483_p3 = pneg %p735_p13 }
  0x1b   : > { %s486_s17 = scalar_lea.hbm %s901_s0, 256  ;;  %p487_p5 = scmp.lt.s32.totalorder %s729_s4, %s901_s0 }
  0x1c   : > { %p484_p4 = pnand %p483_p3, %p482_p2  ;;  %p488_p8 = scmp.lt.s32.totalorder %s486_s17, %s481_s9 }
  0x1e   : > { %p485_p7 = pneg %p484_p4  ;;  %p489_p10 = por %p488_p8, %p487_p5 }
  0x20   : > { %p490_p9 = pnand %p489_p10, %p485_p7 }
  0x22   : > { %493 = shalt.err (!%p490_p9)
}
  0x23   : > { %s494_s22 = scalar_lea.vmem %s739_s6, 128  ;;  %s637_s29 = smov [#allocation2]  }
  0x24   : > { %p495_p0 = scmp.ne.s32.totalorder %s739_s6, %s494_s22  ;;  %s499_s30 = sshll.u32 %s637_s29, 4  ;;  %s500_s30 = int_to_ptr.vmem [resolvable:$false] %s499_s30 }
  0x25   : > { %s501_s5 = scalar_lea.vmem %s500_s30, 256  ;;  %p502_p1 = scmp.lt.s32.totalorder %s739_s6, %s500_s30 }
  0x26   : > { %p497_p2 = pnand %p495_p0, %p483_p3  ;;  %p503_p12 = scmp.lt.s32.totalorder %s501_s5, %s494_s22 }
  0x28   : > { %p498_p4 = pneg %p497_p2  ;;  %p504_p11 = por %p503_p12, %p502_p1 }
  0x2a   : > { %p505_p5 = pnand %p504_p11, %p498_p4 }
  0x2c   : > { %508 = shalt.err (!%p505_p5)
}
  0x2d   : > { %432 = dma.hbm_to_vmem [thread:$0]  (!%p735_p13), %s729_s4, 128, %s739_s6, %s149_s8  }
  0x2e   : > { %p912_p9 = scmp.lt.s32.totalorder %s635_s15, 3  ;;  %p913_p0 = scmp.ge.s32.totalorder %s635_s15, 1 }
  0x2f   : > { %s781_s17 = scalar_lea.hbm %s902_s1, %s407_s27  ;;  %s170_s19 = scalar_lea.vmem [#allocation5], %s406_s28 }
  0x30   : > { %p772_p7 = pnand %p913_p0, %p912_p9  ;;  %s177_s20 = sshll.u32 %s170_s19, 4  ;;  %s178_s20 = int_to_ptr.vmem [resolvable:$true] %s177_s20 }
  0x31   : > { %s167_s4 = scalar_lea.sflag [#allocation6], %s720_s26  ;;  %s509_s6 = scalar_lea.hbm %s781_s17, 128 }
  0x32   : > { %s914_s9 = scalar_select %p772_p7, 1, 0 }
  0x33   : > { %p510_p11 = scmp.ne.s32.totalorder %s781_s17, %s509_s6  ;;  %s514_s29 = scalar_lea.hbm %s902_s1, 256 }
  0x34   : > { %p515_p8 = scmp.lt.s32.totalorder %s781_s17, %s902_s1  ;;  %p516_p10 = scmp.lt.s32.totalorder %s514_s29, %s509_s6 }
  0x35   : > { %p512_p12 = pnand %p510_p11, %p483_p3 }
  0x36   : > { %p517_p2 = por %p516_p10, %p515_p8 }
  0x37   : > { %p513_p1 = pneg %p512_p12 }
  0x39   : > { %p518_p4 = pnand %p517_p2, %p513_p1 }
  0x3b   : > { %521 = shalt.err (!%p518_p4)
}
  0x3c   : > { %s522_s28 = scalar_lea.vmem %s178_s20, 128  ;;  %s638_s26 = smov [#allocation5]  }
  0x3d   : > { %p523_p5 = scmp.ne.s32.totalorder %s178_s20, %s522_s28  ;;  %s527_s5 = sshll.u32 %s638_s26, 4  ;;  %s528_s5 = int_to_ptr.vmem [resolvable:$false] %s527_s5 }
  0x3e   : > { %s529_s10 = scalar_lea.vmem %s528_s5, 256  ;;  %p530_p11 = scmp.lt.s32.totalorder %s178_s20, %s528_s5 }
  0x3f   : > { %p525_p9 = pnand %p523_p5, %p483_p3  ;;  %p531_p12 = scmp.lt.s32.totalorder %s529_s10, %s522_s28 }
  0x41   : > { %p526_p0 = pneg %p525_p9  ;;  %p532_p6 = por %p531_p12, %p530_p11 }
  0x43   : > { %p533_p7 = pnand %p532_p6, %p526_p0 }
  0x45   : > { %536 = shalt.err (!%p533_p7)
}
  0x46   : > { %435 = dma.hbm_to_vmem [thread:$0]  (!%p735_p13), %s781_s17, 128, %s178_s20, %s167_s4  }
  0x47   : > { %p915_p1 = scmp.ne.s32.totalorder %s914_s9, 0 }
  0x48   : > { %s807_s11 = sand.u32 (!%p915_p1), 1, %s627_s13   ;;  %p916_p6 = scmp.ne.s32.totalorder (!%p915_p1), %s908_s23, 0 }
  0x49   : > { %186 = sbr.rel (%p915_p1) target bundleno = 138 (0x8a), region = 28  ;;  %s810_s19 = sshll.u32 (!%p915_p1), %s807_s11, 3 }
  0x4a   : > { %s189_s6 = scalar_lea.sflag (!%p915_p1), [#allocation3], %s807_s11  ;;  %s192_s8 = scalar_lea.vmem (!%p915_p1), [#allocation2], %s810_s19 }
  0x4e   : > { %606 = dma.done.wait (%p916_p6), %s189_s6, 128  }
  0x4f   : > { %608 = vsyncadd (%p916_p6), %s189_s6, 4294967168  ;;  %s198_s7 = scalar_lea.sflag [#allocation6], %s807_s11  ;;  %s201_s9 = scalar_lea.vmem [#allocation5], %s810_s19 }
  0x50   : > { %610 = dma.done.wait (%p916_p6), %s198_s7, 128  }
  0x51   : > { %612 = vsyncadd (%p916_p6), %s198_s7, 4294967168  ;;  %v234_v0 = vld [vmem:[%s192_s8] sm:$0xff]  ;;  %v240_v1 = vld [vmem:[%s201_s9] sm:$0xff]  ;;  %s226_s17 = scalar_lea.vmem [#allocation7], %s810_s19  ;;  %s233_s4 = scalar_lea.vmem [#allocation8], %s810_s19 }
  0x52   : > { %v235_v2 = vmul.f32 0.5, %v234_v0  ;;  %v241_v3 = vmul.f32 0.5, %v240_v1  ;;  %s265_s20 = sshll.u32 %s226_s17, 4  ;;  %s278_s22 = sshll.u32 %s233_s4, 4  ;;  %s827_s20 = int_to_ptr.vmem [resolvable:$true] %s265_s20  ;;  %s829_s22 = int_to_ptr.vmem [resolvable:$true] %s278_s22 }
  0x53   : > { %s417_s29 = sshll.u32 %s682_s16, 7  ;;  %s247_s5 = scalar_lea.sflag [#allocation4], %s807_s11 }
  0x54   : > { %477 = vtanh.f32 %v235_v2  ;;  %s834_s30 = scalar_lea.hbm %s903_s2, %s417_s29  ;;  %s839_s16 = scalar_lea.hbm %s904_s3, %s417_s29 }
  0x55   : > { %479 = vtanh.f32 %v241_v3  ;;  %s537_s10 = scalar_lea.vmem %s827_s20, 128  ;;  %p917_p3 = scmp.ne.s32.totalorder %s909_s24, 0 }
  0x56   : > { %p538_p13 = scmp.ne.s32.totalorder %s827_s20, %s537_s10  ;;  %s639_s19 = smov [#allocation7]  }
  0x57   : > { %s541_s6 = sshll.u32 %s639_s19, 4  ;;  %s542_s6 = int_to_ptr.vmem [resolvable:$false] %s541_s6 }
  0x58   : > { %p539_p7 = pnand %p538_p13, %p917_p3  ;;  %s543_s8 = scalar_lea.vmem %s542_s6, 256 }
  0x59   : > { %p544_p10 = scmp.lt.s32.totalorder %s827_s20, %s542_s6  ;;  %p545_p2 = scmp.lt.s32.totalorder %s543_s8, %s537_s10 }
  0x5a   : > { %p540_p8 = pneg %p539_p7 }
  0x5b   : > { %p546_p4 = por %p545_p2, %p544_p10 }
  0x5d   : > { %p547_p5 = pnand %p546_p4, %p540_p8 }
  0x61   : > { %v478_v4 = vpop.eup %477 }
  0x62   : > { %v480_v5 = vpop.eup %479  ;;  %v237_v6 = vadd.f32 1.0, %v478_v4 }
  0x63   : > { %v243_v7 = vadd.f32 1.0, %v480_v5 }
  0x64   : > { %v238_v8 = vmul.f32 0.5, %v237_v6 }
  0x65   : > { %v244_v9 = vmul.f32 0.5, %v243_v7 }
  0x66   : > { %239 = vst [vmem:[%s226_s17] sm:$0xff] %v238_v8 }
  0x67   : > { %245 = vst [vmem:[%s233_s4] sm:$0xff] %v244_v9 }
  0x68   : > { %550 = shalt.err (!%p547_p5)
}
  0x69   : > { %s551_s7 = scalar_lea.hbm %s834_s30, 128  ;;  %s555_s4 = scalar_lea.hbm %s903_s2, 256 }
  0x6a   : > { %p552_p9 = scmp.ne.s32.totalorder %s834_s30, %s551_s7  ;;  %p556_p12 = scmp.lt.s32.totalorder %s834_s30, %s903_s2 }
  0x6b   : > { %p557_p1 = scmp.lt.s32.totalorder %s555_s4, %s551_s7 }
  0x6c   : > { %p553_p0 = pnand %p552_p9, %p917_p3 }
  0x6d   : > { %p558_p6 = por %p557_p1, %p556_p12 }
  0x6e   : > { %p554_p11 = pneg %p553_p0 }
  0x70   : > { %p559_p13 = pnand %p558_p6, %p554_p11 }
  0x72   : > { %562 = shalt.err (!%p559_p13)
}
  0x73   : > { %425 = dma.vmem_to_hbm [thread:$0]  (%p917_p3), %s827_s20, 128, %s834_s30, %s247_s5  }
  0x74   : > { %s252_s27 = scalar_lea.sflag [#allocation9], %s807_s11  ;;  %s563_s28 = scalar_lea.vmem %s829_s22, 128 }
  0x75   : > { %p564_p7 = scmp.ne.s32.totalorder %s829_s22, %s563_s28  ;;  %s640_s26 = smov [#allocation8]  }
  0x76   : > { %s567_s10 = sshll.u32 %s640_s26, 4  ;;  %s568_s10 = int_to_ptr.vmem [resolvable:$false] %s567_s10 }
  0x77   : > { %p565_p8 = pnand %p564_p7, %p917_p3  ;;  %s569_s19 = scalar_lea.vmem %s568_s10, 256 }
  0x78   : > { %p570_p2 = scmp.lt.s32.totalorder %s829_s22, %s568_s10  ;;  %p571_p4 = scmp.lt.s32.totalorder %s569_s19, %s563_s28 }
  0x79   : > { %p566_p10 = pneg %p565_p8 }
  0x7a   : > { %p572_p5 = por %p571_p4, %p570_p2 }
  0x7c   : > { %p573_p9 = pnand %p572_p5, %p566_p10 }
  0x7e   : > { %576 = shalt.err (!%p573_p9)
}
  0x7f   : > { %s577_s20 = scalar_lea.hbm %s839_s16, 128  ;;  %s581_s5 = scalar_lea.hbm %s904_s3, 256 }
  0x80   : > { %p578_p0 = scmp.ne.s32.totalorder %s839_s16, %s577_s20  ;;  %p582_p1 = scmp.lt.s32.totalorder %s839_s16, %s904_s3 }
  0x81   : > { %p583_p6 = scmp.lt.s32.totalorder %s581_s5, %s577_s20 }
  0x82   : > { %p579_p11 = pnand %p578_p0, %p917_p3 }
  0x83   : > { %p584_p13 = por %p583_p6, %p582_p1 }
  0x84   : > { %p580_p12 = pneg %p579_p11 }
  0x86   : > { %p585_p7 = pnand %p584_p13, %p580_p12 }
  0x88   : > { %588 = shalt.err (!%p585_p7)
}
  0x89   : > { %426 = dma.vmem_to_hbm [thread:$0]  (%p917_p3), %s829_s22, 128, %s839_s16, %s252_s27  }
  0x8a PF: > { %s290_s7 = sand.u32 1, %s623_s12   ;;  %p918_p8 = scmp.ne.s32.totalorder %s910_s25, 0 }
  0x8b   : > { %p919_p10 = scmp.ge.s32.totalorder %s635_s15, 2  ;;  %s291_s9 = scalar_lea.sflag [#allocation4], %s290_s7 }
  0x8d   : > { %p437_p2 = pnand %p919_p10, %p918_p8 }
  0x8f   : > { %p438_p4 = pneg %p437_p2 }
  0x91   : > { %614 = dma.done.wait (%p438_p4), %s291_s9, 128  }
  0x92   : > { %616 = vsyncadd (%p438_p4), %s291_s9, 4294967168  ;;  %s300_s17 = scalar_lea.sflag [#allocation9], %s290_s7 }
  0x93   : > { %618 = dma.done.wait (%p438_p4), %s300_s17, 128  }
  0x94   : > { %620 = vsyncadd (%p438_p4), %s300_s17, 4294967168  ;;  %p23_p3 = scmp.ge.s32.totalorder %s686_s18, 4   ;;  %s920_s12 = smov %s627_s13 }
  0x95   : > { %s921_s13 = smov %s631_s14  ;;  %s922_s14 = smov %s698_s21 }
  0x96   : > { %s923_s15 = smov %s686_s18  ;;  %25 = sbr.rel (!%p23_p3) target bundleno = 9 (0x9), region = 103 }
  0x9b   :  { %305 = vsyncpa [#allocation3], 1 }
  0x9c   :  { %307 = vsyncpa [#allocation3 + $0x1], 1 }
  0x9d   :  { %308 = vsyncpa [#allocation6], 1 }
  0x9e   :  { %310 = vsyncpa [#allocation6 + $0x1], 1 }
  0x9f   :  { %311 = vsyncpa [#allocation4], 1 }
  0xa0   :  { %313 = vsyncpa [#allocation4 + $0x1], 1 }
  0xa1   :  { %314 = vsyncpa [#allocation9], 1 }
  0xa2   :  { %316 = vsyncpa [#allocation9 + $0x1], 1 }

</bundles_post_ra>
